<compile_context>
chip_gen: v5e
topology: v5e:2x2
jax: 0.10.0
libtpu: 0.0.40
codegen_flags: <defaults>
</compile_context>

<pallas_src>
import jax
import jax.numpy as jnp
from jax.experimental import pallas as pl
from jax.experimental.pallas import tpu as pltpu


def _round_up(a: int, b: int) -> int:
    return ((a + b - 1) // b) * b


def attn_net_kernel(x_ref, w1_ref, b1_ref, w2_ref, b2_ref, a_ref):
    # Cast x to the compute (MXU) dtype inside the kernel: no separate XLA
    # pass over x in HBM (the kernel is HBM-bound on the x stream).
    x = x_ref[...].astype(w1_ref.dtype)
    # hidden = tanh(x @ w1 + b1): MXU matmul, f32 accumulation, f32 tanh (EUP).
    h = jnp.tanh(
        jnp.dot(x, w1_ref[...], preferred_element_type=jnp.float32)
        + b1_ref[...].astype(jnp.float32)
    )
    # A = hidden @ w2 + b2.  n_classes is tiny, so the narrow (masked) store is
    # cheap relative to the x loads that dominate this kernel.
    a = (
        jnp.dot(h.astype(w2_ref.dtype), w2_ref[...],
                preferred_element_type=jnp.float32)
        + b2_ref[...].astype(jnp.float32)
    )
    a_ref[...] = a.astype(a_ref.dtype)


def attn_net_forward(x, w1, b1, w2, b2, *, max_tile_n=1024, compute_dtype=None):
    """Returns (A, x) like Attn_Net.forward. A: (N, n_classes), x unchanged.

    max_tile_n: upper bound on rows of x per grid step (rounded to a multiple
        of 8, or 16 for bf16 compute).  1024 keeps the live set ~10 MiB at
        L=1024/D=256 f32, amortizing the ~0.35us per-step overhead while
        staying far below the 48 MiB scoped VMEM budget on v5e/v6e/v7x.
    compute_dtype: optional MXU dtype (e.g. jnp.bfloat16 on v6e/v7x).  x is
        cast in-kernel; weights are cast in the wrapper (tiny); accumulation,
        biases and tanh stay in f32.  For the full bandwidth win, store x in
        bf16 upstream and pass it directly.
    """
    N, L = x.shape
    D = w1.shape[1]
    n_classes = w2.shape[1]

    cdt = jnp.dtype(w1.dtype if compute_dtype is None else compute_dtype)
    out_dtype = x.dtype

    # Row alignment: block second-to-last dim must be a multiple of 8 (the
    # (8,128) rule); bf16 packs 16 rows per vreg so prefer %16 there.
    row_align = 16 if cdt == jnp.dtype(jnp.bfloat16) else 8
    tile_n = max(row_align, (int(max_tile_n) // row_align) * row_align)
    if N >= 2 * row_align:
        # Keep at least two grid steps so the "parallel" N axis can shard
        # across both TensorCores on v7x.
        tile_n = min(tile_n, _round_up(pl.cdiv(N, 2), row_align))
    else:
        tile_n = min(tile_n, _round_up(max(N, 1), row_align))
    assert tile_n % 8 == 0, tile_n

    grid = (pl.cdiv(N, tile_n),)

    # Only the tiny parameters are prepared in the wrapper; x goes in as-is.
    w1_k = w1.astype(cdt)
    b1_k = b1.reshape(1, D).astype(jnp.float32)
    w2_k = w2.astype(cdt)
    b2_k = b2.reshape(1, n_classes).astype(jnp.float32)

    cost = pl.CostEstimate(
        flops=2 * N * (L * D + D * n_classes),
        transcendentals=N * D,
        bytes_accessed=(
            N * L * x.dtype.itemsize
            + (L * D + D * n_classes) * cdt.itemsize
            + (D + n_classes) * 4
            + N * n_classes * jnp.dtype(out_dtype).itemsize
        ),
    )

    a = pl.pallas_call(
        attn_net_kernel,
        out_shape=jax.ShapeDtypeStruct((N, n_classes), out_dtype),
        grid=grid,
        in_specs=[
            # x: streamed over N, double-buffered by the default pipeline.
            pl.BlockSpec((tile_n, L), lambda i: (i, 0)),
            # Weights/biases: constant index_map (fetched once), single
            # buffered to free VMEM headroom for larger x tiles.
            pl.BlockSpec((L, D), lambda i: (0, 0),
                         pipeline_mode=pl.Buffered(1)),
            pl.BlockSpec((1, D), lambda i: (0, 0),
                         pipeline_mode=pl.Buffered(1)),
            pl.BlockSpec((D, n_classes), lambda i: (0, 0),
                         pipeline_mode=pl.Buffered(1)),
            pl.BlockSpec((1, n_classes), lambda i: (0, 0),
                         pipeline_mode=pl.Buffered(1)),
        ],
        out_specs=pl.BlockSpec((tile_n, n_classes), lambda i: (i, 0)),
        compiler_params=pltpu.CompilerParams(
            dimension_semantics=("parallel",),
            vmem_limit_bytes=48 * 1024 * 1024,
        ),
        cost_estimate=cost,
    )(x, w1_k, b1_k, w2_k, b2_k)

    # Pass x through unchanged (PyTorch forward returns (A, x)).
    return a, x


def _reference(x, w1, b1, w2, b2):
    h = jnp.tanh(x @ w1 + b1)
    return h @ w2 + b2


if __name__ == "__main__":
    # Small shapes consistent with the module (L=feature dim, D=hidden, 1 class).
    # N=70 exercises partial-last-block handling both at the default tile and
    # at a small forced tile.
    N, L, D, n_classes = 70, 32, 16, 1

    key = jax.random.PRNGKey(0)
    kx, kw1, kb1, kw2, kb2 = jax.random.split(key, 5)

    x = jax.random.normal(kx, (N, L), dtype=jnp.float32)
    # Deterministic synthetic parameter init (PyTorch-Linear-like scale).
    w1 = jax.random.uniform(kw1, (L, D), jnp.float32, -1.0, 1.0) / jnp.sqrt(L)
    b1 = jax.random.uniform(kb1, (1, D), jnp.float32, -1.0, 1.0) / jnp.sqrt(L)
    w2 = jax.random.uniform(kw2, (D, n_classes), jnp.float32, -1.0, 1.0) / jnp.sqrt(D)
    b2 = jax.random.uniform(kb2, (1, n_classes), jnp.float32, -1.0, 1.0) / jnp.sqrt(D)

    ref = _reference(x, w1, b1, w2, b2)

    # f32 path, default tiling (grid of 2, partial last block): strict check.
    A, x_out = attn_net_forward(x, w1, b1, w2, b2)
    jax.block_until_ready((A, x_out))
    assert A.shape == (N, n_classes)
    assert x_out.shape == (N, L)
    assert jnp.allclose(A, ref, atol=1e-5, rtol=1e-5)
    assert jnp.array_equal(x_out, x)

    # f32 path, small forced tile (grid of 5 with remainder): strict check.
    A_small, _ = attn_net_forward(x, w1, b1, w2, b2, max_tile_n=16)
    jax.block_until_ready(A_small)
    assert jnp.allclose(A_small, ref, atol=1e-5, rtol=1e-5)

    # bf16 compute path (v6e/v7x): f32 accumulation/tanh, loose tolerance.
    A_bf16, _ = attn_net_forward(x, w1, b1, w2, b2, max_tile_n=16,
                                 compute_dtype=jnp.bfloat16)
    jax.block_until_ready(A_bf16)
    assert A_bf16.shape == (N, n_classes)
    assert jnp.allclose(A_bf16, ref, atol=1e-1, rtol=1e-1)

    print("KERNEL_OK")
</pallas_src>

<mosaic_0001>
module attributes {stable_mosaic.version = 11 : i64} {
  func.func @attn_net_kernel(%arg0: i32, %arg1: memref<40x32xf32, #tpu.memory_space<vmem>>, %arg2: memref<32x16xf32, #tpu.memory_space<vmem>>, %arg3: memref<1x16xf32, #tpu.memory_space<vmem>>, %arg4: memref<16x1xf32, #tpu.memory_space<vmem>>, %arg5: memref<1x1xf32, #tpu.memory_space<vmem>>, %arg6: memref<40x1xf32, #tpu.memory_space<vmem>>) attributes {dimension_semantics = [#tpu.dimension_semantics<parallel>], iteration_bounds = array<i64: 2>, scalar_prefetch = 0 : i64, scratch_operands = 0 : i64, tpu.core_type = #tpu.core_type<tc>, window_params = [{transform_indices = @transform_0, window_bounds = array<i64: 40, 32>}, {pipeline_mode = #tpu.pipeline_mode<synchronous>, transform_indices = @transform_1, window_bounds = array<i64: 32, 16>}, {pipeline_mode = #tpu.pipeline_mode<synchronous>, transform_indices = @transform_2, window_bounds = array<i64: 1, 16>}, {pipeline_mode = #tpu.pipeline_mode<synchronous>, transform_indices = @transform_3, window_bounds = array<i64: 16, 1>}, {pipeline_mode = #tpu.pipeline_mode<synchronous>, transform_indices = @transform_4, window_bounds = array<i64: 1, 1>}, {transform_indices = @transform_5, window_bounds = array<i64: 40, 1>}]} {
    %c0 = arith.constant 0 : index
    %c0_0 = arith.constant 0 : index
    %0 = vector.load %arg1[%c0, %c0_0] : memref<40x32xf32, #tpu.memory_space<vmem>>, vector<40x32xf32>
    %c0_1 = arith.constant 0 : index
    %c0_2 = arith.constant 0 : index
    %1 = vector.load %arg2[%c0_1, %c0_2] : memref<32x16xf32, #tpu.memory_space<vmem>>, vector<32x16xf32>
    %cst = arith.constant dense<0.000000e+00> : vector<40x16xf32>
    %2 = tpu.matmul %0, %1, %cst {dimension_numbers = #tpu.dot_dimension_numbers<[1], [0], [0], [1], [0, 0, 1, 1], [], []>} : vector<40x32xf32>, vector<32x16xf32>, vector<40x16xf32> -> vector<40x16xf32>
    %c0_3 = arith.constant 0 : index
    %c0_4 = arith.constant 0 : index
    %3 = vector.load %arg3[%c0_3, %c0_4] : memref<1x16xf32, #tpu.memory_space<vmem>>, vector<1x16xf32>
    %4 = vector.broadcast %3 : vector<1x16xf32> to vector<40x16xf32>
    %5 = arith.addf %2, %4 : vector<40x16xf32>
    %6 = math.tanh %5 : vector<40x16xf32>
    %c0_5 = arith.constant 0 : index
    %c0_6 = arith.constant 0 : index
    %7 = vector.load %arg4[%c0_5, %c0_6] : memref<16x1xf32, #tpu.memory_space<vmem>>, vector<16x1xf32>
    %cst_7 = arith.constant dense<0.000000e+00> : vector<40x1xf32>
    %8 = tpu.matmul %6, %7, %cst_7 {dimension_numbers = #tpu.dot_dimension_numbers<[1], [0], [0], [1], [0, 0, 1, 1], [], []>} : vector<40x16xf32>, vector<16x1xf32>, vector<40x1xf32> -> vector<40x1xf32>
    %c0_8 = arith.constant 0 : index
    %c0_9 = arith.constant 0 : index
    %9 = vector.load %arg5[%c0_8, %c0_9] : memref<1x1xf32, #tpu.memory_space<vmem>>, vector<1x1xf32>
    %10 = vector.broadcast %9 : vector<1x1xf32> to vector<40x1xf32>
    %11 = arith.addf %8, %10 : vector<40x1xf32>
    %c0_10 = arith.constant 0 : index
    %c0_11 = arith.constant 0 : index
    %12 = vector.load %arg6[%c0_10, %c0_11] : memref<40x1xf32, #tpu.memory_space<vmem>>, vector<40x1xf32>
    tpu.vector_store %arg6[%c0_10, %c0_11], %11 {strides = array<i32>} : memref<40x1xf32, #tpu.memory_space<vmem>>, vector<40x1xf32>,
    return
  }
  func.func @transform_0(%arg0: i32) -> (i32, i32) {
    %c0_i32 = arith.constant 0 : i32
    %c0_i32_0 = arith.constant 0 : i32
    return %arg0, %c0_i32 : i32, i32
  }
  func.func @transform_1(%arg0: i32) -> (i32, i32) {
    %c0_i32 = arith.constant 0 : i32
    %c0_i32_0 = arith.constant 0 : i32
    %c0_i32_1 = arith.constant 0 : i32
    return %c0_i32, %c0_i32_0 : i32, i32
  }
  func.func @transform_2(%arg0: i32) -> (i32, i32) {
    %c0_i32 = arith.constant 0 : i32
    %c0_i32_0 = arith.constant 0 : i32
    %c0_i32_1 = arith.constant 0 : i32
    return %c0_i32, %c0_i32_0 : i32, i32
  }
  func.func @transform_3(%arg0: i32) -> (i32, i32) {
    %c0_i32 = arith.constant 0 : i32
    %c0_i32_0 = arith.constant 0 : i32
    %c0_i32_1 = arith.constant 0 : i32
    return %c0_i32, %c0_i32_0 : i32, i32
  }
  func.func @transform_4(%arg0: i32) -> (i32, i32) {
    %c0_i32 = arith.constant 0 : i32
    %c0_i32_0 = arith.constant 0 : i32
    %c0_i32_1 = arith.constant 0 : i32
    return %c0_i32, %c0_i32_0 : i32, i32
  }
  func.func @transform_5(%arg0: i32) -> (i32, i32) {
    %c0_i32 = arith.constant 0 : i32
    %c0_i32_0 = arith.constant 0 : i32
    return %arg0, %c0_i32 : i32, i32
  }
}

</mosaic_0001>

<bundles_post_ra>
// kernel: tpu_custom_call.1
= control target key start
LH: loop header
LB: loop body
LE: loop exit
PB: predicated region body
PF: predicated region fallthrough
CT: control target
= control target key end

     0   :  { %s1002_s0 = inlined_call_operand.vmem [shape: f32[70,32], index: 0, kind: input, shape index: {}]   ;;  %s1003_s1 = inlined_call_operand.vmem [shape: f32[32,16], index: 1, kind: input, shape index: {}]   ;;  %s1004_s2 = inlined_call_operand.vmem [shape: f32[1,16], index: 2, kind: input, shape index: {}]   ;;  %s1005_s3 = inlined_call_operand.vmem [shape: f32[16,1], index: 3, kind: input, shape index: {}]   ;;  %s1006_s4 = inlined_call_operand.<no memory space> [shape: f32[1,1], index: 4, kind: input, shape index: {}]   ;;  %s1007_s5 = inlined_call_operand.vmem [shape: f32[70,1], index: 5, kind: output, shape index: {}]  }
   0x1   :  { %v10_v0 = vstv %s1006_s4 }
   0x2   :  { %11 = vst [vmem:[#allocation2] sm:$0x1] %v10_v0 }
   0x3   :  { %s871_s20 = smov 0   ;;  %s873_s21 = smov 0  }
   0x4   :  { %s875_s22 = smov 0  }
   0x5 LB: > { %s884_s4 = sadd.s32 4294967295, %s804_s22   ;;  %s886_s23 = sadd.s32 1, %s804_s22   ;;  %s804_s22 = sphi %s875_s22, %s1014_s22   ;;  %s800_s21 = sphi %s873_s21, %s1013_s21   ;;  %s796_s20 = sphi %s871_s20, %s1012_s20  }
   0x6   : > { %s131_s24 = ssub.s32 %s804_s22, %s886_s23  ;;  %s134_s25 = sadd.s32 1, %s800_s21 }
   0x7   : > { %p132_p0 = scmp.eq.s32.totalorder %s131_s24, 0  ;;  %p144_p1 = scmp.ne.s32.totalorder %s800_s21, %s796_s20 }
   0x8   : > { %p145_p2 = scmp.eq.s32.totalorder %s884_s4, 1  ;;  %p611_p3 = scmp.ge.s32.totalorder %s804_s22, 1 }
   0x9   : > { %s894_s26 = scalar_select %p132_p0, %s800_s21, %s134_s25  }
   0xa   : > { %p896_p4 = por %p145_p2, %p144_p1  ;;  %p198_p5 = scmp.lt.s32.totalorder %s804_s22, 3 }
   0xc   : > { %p199_p6 = pnand %p611_p3, %p198_p5 }
   0xd   : > { %s907_s7 = smul.u32 (!%p199_p6), 5, %s884_s4  ;;  %s226_s28 = sand.u32 (!%p199_p6), 1, %s796_s20  }
   0xe   : > { %202 = sbr.rel (%p199_p6) target bundleno = 365 (0x16d), region = 40 }
   0xf   : > { %p234_p7 = scmp.lt.s32.totalorder (!%p199_p6), %s907_s7, 8  ;;  %s642_s29 = smul.u32 (!%p199_p6), 40, %s226_s28 }
  0x11   : > { %s935_s30 = scalar_lea.vmem (!%p199_p6), [#allocation3], %s642_s29  }
  0x13   : > { %v256_v1 = vld [vmem:[%s1003_s1 + $0x18] sm:$0xff]  ;;  %v255_v2 = vld [vmem:[%s1003_s1 + $0x10] sm:$0xff]  ;;  %v254_v3 = vld [vmem:[%s1003_s1 + $0x8] sm:$0xff]  ;;  %s235_s12 = scalar_select %p234_p7, %s907_s7, 8  ;;  %vm261_vm0 = vcmask 261120   ;;  %vm320_vm1 = vcmask 130048  }
  0x14   : > { %636 = vmatpush.msra.mxu2 %v256_v1  ;;  %289 = vmatpush.msra.mxu0 %v256_v1  ;;  %v253_v4 = vld [vmem:[%s1003_s1] sm:$0xff]  ;;  %v315_v10 = vld [vmem:[%s1005_s3 + $0x8] sm:$0xff]  ;;  %vm368_vm2 = vcmask 7168   ;;  %s382_s20 = ssub.s32 (%p896_p4), 9, %s907_s7  ;;  %s635_s6 = smul.u32 (%p896_p4), 40, %s884_s4 }
  0x15   : > { %s612_s13 = sshll.u32 %s235_s12, 3  ;;  %350 = vmatpush.msra.mxu1 %v315_v10  ;;  %640 = vmatpush.msra.mxu3 %v315_v10  ;;  %v314_v11 = vld [vmem:[%s1005_s3] sm:$0xff]  ;;  %p383_p8 = scmp.lt.s32.totalorder (%p896_p4), %s382_s20, 5 }
  0x16   : > { %637 = vmatpush.msra.mxu2 %v255_v2  ;;  %290 = vmatpush.msra.mxu0 %v255_v2  ;;  %s237_s16 = scalar_lea.vmem %s1002_s0, %s612_s13  ;;  %v732_v12 = vld [vmem:[%s1004_s2] ss:$0 sm:$0xff]  ;;  %s949_s10 = scalar_lea.vmem (%p896_p4), %s1007_s5, %s635_s6  }
  0x17   : > { %v251_v5 = vld [vmem:[%s237_s16 + $0x18] sm:$0xff]  ;;  %v248_v6 = vld [vmem:[%s237_s16] sm:$0xff]  ;;  %v249_v8 = vld [vmem:[%s237_s16 + $0x8] sm:$0xff]  ;;  %351 = vmatpush.msra.mxu1 %v314_v11  ;;  %641 = vmatpush.msra.mxu3 %v314_v11 }
  0x18   : > { %638 = vmatpush.msra.mxu2 %v254_v3  ;;  %291 = vmatpush.msra.mxu0 %v254_v3  ;;  %v252_v7 = vld [vmem:[%s237_s16 + $0x20] sm:$0xff]  ;;  %v250_v9 = vld [vmem:[%s237_s16 + $0x10] sm:$0xff] }
  0x19   : > { %v733_v28 = vld [vmem:[#allocation2] ss:$0 sm:$0xff] }
  0x1a   : > { %639 = vmatpush.msra.mxu2 %v253_v4  ;;  %292 = vmatpush.msra.mxu0 %v253_v4 }
  0x1b   : > { %616 = vmatmul.msk.f32.vlgmr.msra.gmra.mxu2 %vm261_vm0, %v251_v5  ;;  %613 = vmatmul.msk.f32.vlgmr.msra.gmra.mxu0 %vm261_vm0, %v248_v6 }
  0x23   : > { %617 = vmatmul.msk.f32.gmra.mxu2 %vm261_vm0, %v252_v7  ;;  %614 = vmatmul.msk.f32.gmra.mxu0 %vm261_vm0, %v249_v8 }
  0x2b   : > { %615 = vmatmul.msk.f32.gmra.mxu0 %vm261_vm0, %v250_v9 }
  0x98   : > { %v294_v13 = vpop.f32.mrf.mxu0 }
  0x99   : > { %v295_v14 = vadd.f32 %v732_v12, %v294_v13 }
  0x9b   : > { %734 = vtanh.f32 %v295_v14 }
  0x9e   : > { %v303_v15 = vpop.f32.mrf.mxu2 }
  0x9f   : > { %v304_v16 = vadd.f32 %v732_v12, %v303_v15 }
  0xa0   : > { %v297_v17 = vpop.f32.mrf.mxu0 }
  0xa1   : > { %v735_v18 = vpop.eup %734  ;;  %736 = vtanh.f32 %v304_v16  ;;  %v298_v19 = vadd.f32 %v732_v12, %v297_v17 }
  0xa2   : > { %618 = vmatmul.msk.f32.vlgmr.msra.gmra.mxu1 %vm320_vm1, %v735_v18 }
  0xa3   : > { %738 = vtanh.f32 %v298_v19 }
  0xa6   : > { %v306_v20 = vpop.f32.mrf.mxu2 }
  0xa7   : > { %v737_v21 = vpop.eup %736  ;;  %v307_v22 = vadd.f32 %v732_v12, %v306_v20 }
  0xa8   : > { %621 = vmatmul.msk.f32.vlgmr.msra.gmra.mxu3 %vm320_vm1, %v737_v21  ;;  %v300_v23 = vpop.f32.mrf.mxu0 }
  0xa9   : > { %v739_v24 = vpop.eup %738  ;;  %740 = vtanh.f32 %v307_v22  ;;  %v301_v25 = vadd.f32 %v732_v12, %v300_v23 }
  0xaa   : > { %619 = vmatmul.msk.f32.gmra.mxu1 %vm320_vm1, %v739_v24 }
  0xab   : > { %742 = vtanh.f32 %v301_v25 }
  0xaf   : > { %v741_v26 = vpop.eup %740 }
  0xb0   : > { %622 = vmatmul.msk.f32.gmra.mxu3 %vm320_vm1, %v741_v26 }
  0xb1   : > { %v743_v27 = vpop.eup %742 }
  0xb2   : > { %620 = vmatmul.msk.f32.gmra.mxu1 %vm320_vm1, %v743_v27 }
 0x11f   : > { %v353_v29 = vpop.f32.mrf.mxu1 }
 0x120   : > { %v354_v30 = vadd.f32 %v733_v28, %v353_v29 }
 0x122   : > { %369 = vst.msk [vmem:[%s935_s30] sm:$0xff] %vm368_vm2, %v354_v30 }
 0x127   : > { %v356_v31 = vpop.f32.mrf.mxu1 }
 0x128   : > { %v357_v32 = vadd.f32 %v733_v28, %v356_v31 }
 0x12a   : > { %370 = vst.msk [vmem:[%s935_s30 + $0x8] sm:$0xff] %vm368_vm2, %v357_v32 }
 0x12b   : > { %v362_v33 = vpop.f32.mrf.mxu3 }
 0x12c   : > { %v363_v34 = vadd.f32 %v733_v28, %v362_v33 }
 0x12e   : > { %372 = vst.msk [vmem:[%s935_s30 + $0x18] sm:$0xff] %vm368_vm2, %v363_v34 }
 0x12f   : > { %v359_v35 = vpop.f32.mrf.mxu1 }
 0x130   : > { %v360_v36 = vadd.f32 %v733_v28, %v359_v35 }
 0x132   : > { %371 = vst.msk [vmem:[%s935_s30 + $0x10] sm:$0xff] %vm368_vm2, %v360_v36  ;;  %380 = sbr.rel (!%p896_p4) target bundleno = 365 (0x16d), region = 44 }
 0x133   : > { %v365_v37 = vpop.f32.mrf.mxu3 }
 0x134   : > { %v366_v38 = vadd.f32 %v733_v28, %v365_v37 }
 0x136   : > { %373 = vst.msk [vmem:[%s935_s30 + $0x20] sm:$0xff] %vm368_vm2, %v366_v38 }
 0x137   : > { %s1016_s20 = smov (!%p383_p8, %s382_s20), 5 }
 0x138   : > { %s623_s11 = sshll.u32 %s1016_s20, 3 }
 0x139   : > { %p626_p9 = scmp.eq.s32.totalorder %s623_s11, 0 }
 0x13a   : > { %744 = sdivrem.u32 (!%p626_p9), %s1016_s20, 5 }
 0x13b   : > { %391 = sbr.rel (%p626_p9) target bundleno = 365 (0x16d), region = 48 }
 0x143   : > { %s955_s27 = spop.drf %744 }
 0x144   : > { %s746_s12 = spop.drf %744  ;;  %p627_p10 = scmp.le.s32.totalorder %s955_s27, 0 }
 0x145   : > { %s1009_s4 = smov (!%p627_p10), %s949_s10  ;;  %s1010_s7 = smov (!%p627_p10), %s935_s30 }
 0x146   : > { %564 = sbr.rel (%p627_p10) target bundleno = 339 (0x153), region = 124  ;;  %s964_s13 = smov (!%p627_p10), 0  }
 0x147   : > { %s966_s14 = smov (!%p627_p10), 0  }
 0x14b LB: >> { %v464_v39 = vld [vmem:[%s812_s7] sm:$0xff]  ;;  %v466_v40 = vld [vmem:[%s812_s7 + $0x8] sm:$0xff]  ;;  %v468_v41 = vld [vmem:[%s812_s7 + $0x10] sm:$0xff]  ;;  %s474_s15 = sadd.s32 1, %s816_s13  ;;  %s458_s14 = sadd.s32 1, %s820_s14   ;;  %s820_s14 = sphi %s966_s14, %s458_s14   ;;  %s816_s13 = sphi %s964_s13, %s1011_s13   ;;  %s812_s7 = sphi %s1010_s7, %s479_s7   ;;  %s808_s4 = sphi %s1009_s4, %s480_s4  }
 0x14c   : >> { %465 = vst [vmem:[%s808_s4] sm:$0xff] %v464_v39  ;;  %v470_v42 = vld [vmem:[%s812_s7 + $0x18] sm:$0xff]  ;;  %p475_p11 = scmp.ge.s32.totalorder %s474_s15, %s955_s27  ;;  %v472_v43 = vld [vmem:[%s812_s7 + $0x20] sm:$0xff]  ;;  %p457_p12 = scmp.ge.s32.totalorder %s458_s14, %s955_s27 }
 0x14d   : >> { %467 = vst [vmem:[%s808_s4 + $0x8] sm:$0xff] %v466_v40 }
 0x14e   : >> { %469 = vst [vmem:[%s808_s4 + $0x10] sm:$0xff] %v468_v41  ;;  %s1018_s15 = smov (%p475_p11, %s474_s15), 0  ;;  %460 = sbr.rel (!%p457_p12) target bundleno = 331 (0x14b), region = 130 }
 0x14f   : >> { %471 = vst [vmem:[%s808_s4 + $0x18] sm:$0xff] %v470_v42  ;;  %s477_s16 = smul.u32 40, %s1018_s15  ;;  %s1011_s13 = smov %s1018_s15 }
 0x150   : >> { %473 = vst [vmem:[%s808_s4 + $0x20] sm:$0xff] %v472_v43 }
 0x151   : >> { %s479_s7 = scalar_lea.vmem %s935_s30, %s477_s16 [#allocation3]   ;;  %s480_s4 = scalar_lea.vmem %s949_s10, %s477_s16  }
 0x153 PF: > { %747 = sdivrem.u32 %s1016_s20, 5 }
 0x154   : > { %s628_s17 = smul.u32 40, %s955_s27 }
 0x156   : > { %s987_s18 = scalar_lea.vmem %s935_s30, %s628_s17 [#allocation3]   ;;  %s487_s19 = scalar_lea.vmem %s949_s10, %s628_s17  }
 0x15c   : > { %s748_s22 = spop.drf %747 }
 0x15d   : > { %s749_s24 = spop.drf %747 }
 0x15e   : > { %p630_p13 = scmp.le.s32.totalorder %s749_s24, 0 }
 0x15f   : > { %s822_s25 = smov (!%p630_p13), %s487_s19   ;;  %s826_s28 = smov (!%p630_p13), %s987_s18  }
 0x160   : > { %578 = sbr.rel (%p630_p13) target bundleno = 365 (0x16d), region = 135  ;;  %s830_s29 = smov (!%p630_p13), 0  }
 0x161   : > { %s834_s6 = smov (!%p630_p13), 0  }
 0x165 LB: >> { %v497_v44 = vld [vmem:[%s828_s28] sm:$0xff]  ;;  %s499_s30 = sadd.s32 1, %s832_s29  ;;  %s491_s6 = sadd.s32 1, %s836_s6   ;;  %s836_s6 = sphi %s834_s6, %s491_s6   ;;  %s832_s29 = sphi %s830_s29, %s831_s29   ;;  %s828_s28 = sphi %s826_s28, %s504_s28   ;;  %s824_s25 = sphi %s822_s25, %s505_s25  }
 0x166   : >> { %498 = vst [vmem:[%s824_s25] sm:$0xff] %v497_v44  ;;  %p500_p0 = scmp.ge.s32.totalorder %s499_s30, %s749_s24  ;;  %p490_p1 = scmp.ge.s32.totalorder %s491_s6, %s749_s24 }
 0x168   : >> { %s1020_s30 = smov (%p500_p0, %s499_s30), 0  ;;  %493 = sbr.rel (!%p490_p1) target bundleno = 357 (0x165), region = 141 }
 0x169   : >> { %s631_s20 = sshll.u32 %s1020_s30, 3  ;;  %s831_s29 = smov %s1020_s30  }
 0x16a   : >> { %s504_s28 = scalar_lea.vmem %s987_s18, %s631_s20 [#allocation3]   ;;  %s505_s25 = scalar_lea.vmem %s487_s19, %s631_s20  }
 0x16d PF: > { %p14_p2 = scmp.ge.s32.totalorder %s886_s23, 4   ;;  %s1012_s20 = smov %s800_s21 }
 0x16e   : > { %s1013_s21 = smov %s894_s26  ;;  %s1014_s22 = smov %s886_s23 }
 0x16f   :  { %16 = sbr.rel (!%p14_p2) target bundleno = 5 (0x5), region = 152 }

</bundles_post_ra>
